<compile_context>
chip_gen: v5e
topology: v5e:2x2
jax: 0.10.0
libtpu: 0.0.40
codegen_flags: <defaults>
</compile_context>

<pallas_src>
import jax
import jax.numpy as jnp
from jax.experimental import pallas as pl
from jax.experimental.pallas import tpu as pltpu


N1 = 512   # linear1 out features
N2 = 512   # linear2 out features


# --------------------------------------------------------------------------
# Kernel
# --------------------------------------------------------------------------
def _mlp_kernel(x_ref, w1_ref, b1_ref, w2_ref, b2_ref, o_ref, acc_ref):
    # x_ref : (tm, tk)   input dtype (cast to bf16 here, feeding the MXU)
    # w1_ref: (tk, N1)   bf16  (pre-transposed: in x out)
    # b1_ref: (1, N1)    f32
    # w2_ref: (N1, N2)   bf16
    # b2_ref: (1, N2)    f32
    # o_ref : (tm, N2)   output dtype
    # acc_ref: (tm, N1)  f32 scratch accumulator (resident across K steps)
    k = pl.program_id(1)

    @pl.when(k == 0)
    def _():
        acc_ref[...] = jnp.zeros_like(acc_ref)

    acc_ref[...] += jnp.dot(x_ref[...].astype(jnp.bfloat16), w1_ref[...],
                            preferred_element_type=jnp.float32)

    @pl.when(k == pl.num_programs(1) - 1)
    def _():
        h = acc_ref[...] + b1_ref[...]                      # f32 bias add
        y = jnp.dot(h.astype(jnp.bfloat16), w2_ref[...],
                    preferred_element_type=jnp.float32)
        o_ref[...] = (y + b2_ref[...]).astype(o_ref.dtype)  # f32 bias add


# --------------------------------------------------------------------------
# Sizing helpers
# --------------------------------------------------------------------------
def _vmem_bytes(tm, tk, n1, n2, x_itemsize, out_itemsize, w1_buffers):
    """Rough VMEM footprint of one pipelined grid step."""
    x_tiles = 2 * tm * tk * x_itemsize             # x tile, double-buffered, native dtype
    w1_tiles = w1_buffers * tk * n1 * 2            # bf16 W1 tile(s)
    o_tiles = 2 * tm * n2 * out_itemsize           # output tile, double-buffered
    consts = n1 * n2 * 2 + (n1 + n2) * 4           # resident W2 (bf16) + biases (f32)
    acc = tm * n1 * 4                              # f32 accumulator scratch
    interm = tm * n2 * 4                           # f32 second-dot result in the body
    return x_tiles + w1_tiles + o_tiles + consts + acc + interm


def _chip_config():
    """Returns (working-set budget, vmem_limit cap, has 2 TensorCores)."""
    kind = ""
    try:
        kind = jax.devices()[0].device_kind.lower()
    except Exception:
        pass
    two_cores = "v7" in kind                       # v7x: 2 TCs, 64 MiB VMEM per TC
    phys = None
    try:
        phys = int(pltpu.get_tpu_info().vmem_capacity_bytes)
    except Exception:
        phys = None
    if not phys or phys <= 0:
        phys = (64 << 20) if two_cores else (128 << 20)
    budget = min(phys * 3 // 4, (48 << 20) if two_cores else (100 << 20))
    limit_cap = min(phys * 7 // 8, (56 << 20) if two_cores else (112 << 20))
    return budget, limit_cap, two_cores


def _choose_tiles(m, h_in, x_itemsize, out_itemsize, budget, two_cores, tm_req):
    # ---- M tile ----
    if m >= 8:
        tm = max(8, min(int(tm_req), m))
        tm = (tm // 8) * 8                         # sublane-aligned block
        if two_cores and m >= 16:
            # Only on 2-TensorCore chips: keep >= 2 grid steps so the
            # "parallel" M axis can be sharded across both cores.
            half = max(8, ((m // 2) // 8) * 8)
            tm = min(tm, half)
    else:
        tm = m                                     # block == full dim (allowed)

    def fits(tm_, tk_, nk_):
        w1_buf = 1 if nk_ == 1 else 2
        return _vmem_bytes(tm_, tk_, N1, N2, x_itemsize, out_itemsize,
                           w1_buf) <= budget

    # ---- K tile: prefer a single resident W1 block (tk == H_in) ----
    if fits(tm, h_in, 1):
        return tm, h_in

    # Very large H_in: tile the reduction axis (multiples of 128) instead of
    # collapsing tm; shrink tm only if even tk=128 does not fit.
    while True:
        for tk in (2048, 1024, 512, 256, 128):
            if tk < h_in and fits(tm, tk, 2):
                return tm, tk
        if tm <= 8:
            return 8, 128                          # last resort
        tm = max(8, ((tm // 2) // 8) * 8)


# --------------------------------------------------------------------------
# Wrappers
# --------------------------------------------------------------------------
def prepare_params(w1, b1, w2, b2):
    """One-time parameter prep (hoist out of the hot path):
    W1 [512,H_in] -> (H_in,512) bf16, W2 [512,512] -> (512,512) bf16,
    biases -> f32 row vectors."""
    return (jnp.asarray(w1).T.astype(jnp.bfloat16),
            jnp.asarray(b1).astype(jnp.float32).reshape(1, -1),
            jnp.asarray(w2).T.astype(jnp.bfloat16),
            jnp.asarray(b2).astype(jnp.float32).reshape(1, -1))


def example_high_layers_prepared(hidden_states, w1_t, b1_r, w2_t, b2_r, *,
                                 tm=1024, out_dtype=None):
    """hidden_states: [..., H_in] -> [..., 512], with prepared params."""
    orig_shape = hidden_states.shape
    h_in = orig_shape[-1]
    n1 = w1_t.shape[1]
    n2 = w2_t.shape[1]

    out_dtype = hidden_states.dtype if out_dtype is None else jnp.dtype(out_dtype)
    x_itemsize = jnp.dtype(hidden_states.dtype).itemsize
    out_itemsize = jnp.dtype(out_dtype).itemsize

    x = hidden_states.reshape(-1, h_in)
    m = x.shape[0]

    budget, limit_cap, two_cores = _chip_config()
    tm, tk = _choose_tiles(m, h_in, x_itemsize, out_itemsize, budget,
                           two_cores, tm)

    # Zero-pad H_in so the reduction grid has no partial (garbage-read) block.
    # Never triggered on the single-K-block path (tk == h_in).
    k_pad = (-h_in) % tk
    if k_pad:
        # TODO(synk): pre-pad the weights alongside prepare_params so only x
        # pays this pass, or fold the pad into the producer of x.
        x = jnp.pad(x, ((0, 0), (0, k_pad)))
        w1_t = jnp.pad(w1_t, ((0, k_pad), (0, 0)))
    nk = (h_in + k_pad) // tk

    grid = (pl.cdiv(m, tm), nk)

    ws = _vmem_bytes(tm, tk, n1, n2, x_itemsize, out_itemsize,
                     1 if nk == 1 else 2)
    vmem_limit = int(min(max(ws + (8 << 20), 32 << 20), limit_cap))

    resident = pl.Buffered(buffer_count=1)         # constant-index blocks
    w1_kwargs = dict(pipeline_mode=resident) if nk == 1 else {}

    cost = pl.CostEstimate(
        flops=2 * m * (h_in * n1 + n1 * n2),
        transcendentals=0,
        bytes_accessed=(m * h_in * x_itemsize + h_in * n1 * 2 + n1 * n2 * 2
                        + (n1 + n2) * 4 + m * n2 * out_itemsize),
    )

    out = pl.pallas_call(
        _mlp_kernel,
        out_shape=jax.ShapeDtypeStruct((m, n2), out_dtype),
        grid_spec=pltpu.PrefetchScalarGridSpec(
            num_scalar_prefetch=0,
            grid=grid,
            in_specs=[
                pl.BlockSpec((tm, tk), lambda i, k: (i, k)),
                pl.BlockSpec((tk, n1), lambda i, k: (k, 0), **w1_kwargs),
                pl.BlockSpec((1, n1), lambda i, k: (0, 0), pipeline_mode=resident),
                pl.BlockSpec((n1, n2), lambda i, k: (0, 0), pipeline_mode=resident),
                pl.BlockSpec((1, n2), lambda i, k: (0, 0), pipeline_mode=resident),
            ],
            out_specs=pl.BlockSpec((tm, n2), lambda i, k: (i, 0)),
            scratch_shapes=[pltpu.VMEM((tm, n1), jnp.float32)],
        ),
        compiler_params=pltpu.CompilerParams(
            dimension_semantics=("parallel", "arbitrary"),
            vmem_limit_bytes=vmem_limit,
        ),
        cost_estimate=cost,
    )(x, w1_t, b1_r, w2_t, b2_r)

    return out.reshape(orig_shape[:-1] + (n2,))


def example_high_layers(hidden_states, w1, b1, w2, b2, *, tm=1024, out_dtype=None):
    """Drop-in wrapper taking PyTorch-layout params (w1: [512, H_in], etc.).
    Prefer prepare_params + example_high_layers_prepared in a hot loop so the
    weight transpose/cast is paid once, not per forward call."""
    w1_t, b1_r, w2_t, b2_r = prepare_params(w1, b1, w2, b2)
    return example_high_layers_prepared(hidden_states, w1_t, b1_r, w2_t, b2_r,
                                        tm=tm, out_dtype=out_dtype)


def init_params(key, input_hidden_size):
    """Deterministic init mimicking nn.Linear default (uniform +/- 1/sqrt(fan_in))."""
    k1, k2, k3, k4 = jax.random.split(key, 4)
    bound1 = 1.0 / (input_hidden_size ** 0.5)
    bound2 = 1.0 / (512 ** 0.5)
    w1 = jax.random.uniform(k1, (512, input_hidden_size), jnp.float32, -bound1, bound1)
    b1 = jax.random.uniform(k2, (512,), jnp.float32, -bound1, bound1)
    w2 = jax.random.uniform(k3, (512, 512), jnp.float32, -bound2, bound2)
    b2 = jax.random.uniform(k4, (512,), jnp.float32, -bound2, bound2)
    return w1, b1, w2, b2


if __name__ == "__main__":
    key = jax.random.PRNGKey(0)
    k_x, k_p = jax.random.split(key)

    batch, seq, input_hidden_size = 2, 8, 32
    x = jax.random.normal(k_x, (batch, seq, input_hidden_size), jnp.float32)
    w1, b1, w2, b2 = init_params(k_p, input_hidden_size)

    # Hoisted one-time weight prep (transpose + bf16 cast), then the kernel.
    params = prepare_params(w1, b1, w2, b2)
    y = example_high_layers_prepared(x, *params)
    y = jax.block_until_ready(y)

    # Reference check in plain JAX (f32). The kernel uses bf16 weights and
    # bf16-cast activations with f32 accumulation, so tolerance is loosened.
    ref = (x @ w1.T + b1) @ w2.T + b2
    assert y.shape == (batch, seq, 512), y.shape
    max_err = float(jnp.max(jnp.abs(y - ref)))
    assert jnp.allclose(y, ref, atol=3e-2, rtol=2e-2), max_err

    print("KERNEL_OK")
</pallas_src>

<mosaic_0001>
module attributes {stable_mosaic.version = 11 : i64} {
  func.func @_mlp_kernel(%arg0: i32, %arg1: i32, %arg2: memref<16x32xf32, #tpu.memory_space<vmem>>, %arg3: memref<32x512xbf16, #tpu.memory_space<vmem>>, %arg4: memref<1x512xf32, #tpu.memory_space<vmem>>, %arg5: memref<512x512xbf16, #tpu.memory_space<vmem>>, %arg6: memref<1x512xf32, #tpu.memory_space<vmem>>, %arg7: memref<16x512xf32, #tpu.memory_space<vmem>>, %arg8: memref<16x512xf32, #tpu.memory_space<vmem>>) attributes {dimension_semantics = [#tpu.dimension_semantics<parallel>, #tpu.dimension_semantics<arbitrary>], iteration_bounds = array<i64: 1, 1>, scalar_prefetch = 0 : i64, scratch_operands = 1 : i64, tpu.core_type = #tpu.core_type<tc>, window_params = [{transform_indices = @transform_0, window_bounds = array<i64: 16, 32>}, {pipeline_mode = #tpu.pipeline_mode<synchronous>, transform_indices = @transform_1, window_bounds = array<i64: 32, 512>}, {pipeline_mode = #tpu.pipeline_mode<synchronous>, transform_indices = @transform_2, window_bounds = array<i64: 1, 512>}, {pipeline_mode = #tpu.pipeline_mode<synchronous>, transform_indices = @transform_3, window_bounds = array<i64: 512, 512>}, {pipeline_mode = #tpu.pipeline_mode<synchronous>, transform_indices = @transform_4, window_bounds = array<i64: 1, 512>}, {transform_indices = @transform_5, window_bounds = array<i64: 16, 512>}]} {
    %c0_i32 = arith.constant 0 : i32
    %0 = arith.cmpi eq, %arg1, %c0_i32 : i32
    %1 = arith.extui %0 : i1 to i32
    %c0_i32_0 = arith.constant 0 : i32
    %2 = arith.cmpi ne, %1, %c0_i32_0 : i32
    scf.if %2 {
      %cst_10 = arith.constant 0.000000e+00 : f32
      %13 = vector.broadcast %cst_10 : f32 to vector<16x512xf32>
      %c0_11 = arith.constant 0 : index
      %c0_12 = arith.constant 0 : index
      %14 = vector.load %arg8[%c0_11, %c0_12] : memref<16x512xf32, #tpu.memory_space<vmem>>, vector<16x512xf32>
      tpu.vector_store %arg8[%c0_11, %c0_12], %13 {strides = array<i32>} : memref<16x512xf32, #tpu.memory_space<vmem>>, vector<16x512xf32>,
    } else {
    }
    %c0 = arith.constant 0 : index
    %c0_1 = arith.constant 0 : index
    %3 = vector.load %arg8[%c0, %c0_1] : memref<16x512xf32, #tpu.memory_space<vmem>>, vector<16x512xf32>
    %c0_2 = arith.constant 0 : index
    %c0_3 = arith.constant 0 : index
    %4 = vector.load %arg2[%c0_2, %c0_3] : memref<16x32xf32, #tpu.memory_space<vmem>>, vector<16x32xf32>
    %5 = arith.truncf %4 : vector<16x32xf32> to vector<16x32xbf16>
    %c0_4 = arith.constant 0 : index
    %c0_5 = arith.constant 0 : index
    %6 = vector.load %arg3[%c0_4, %c0_5] : memref<32x512xbf16, #tpu.memory_space<vmem>>, vector<32x512xbf16>
    %cst = arith.constant dense<0.000000e+00> : vector<16x512xf32>
    %7 = tpu.matmul %5, %6, %cst {dimension_numbers = #tpu.dot_dimension_numbers<[1], [0], [0], [1], [0, 0, 1, 1], [], []>} : vector<16x32xbf16>, vector<32x512xbf16>, vector<16x512xf32> -> vector<16x512xf32>
    %8 = arith.addf %3, %7 : vector<16x512xf32>
    %c0_6 = arith.constant 0 : index
    %c0_7 = arith.constant 0 : index
    %9 = vector.load %arg8[%c0_6, %c0_7] : memref<16x512xf32, #tpu.memory_space<vmem>>, vector<16x512xf32>
    tpu.vector_store %arg8[%c0_6, %c0_7], %8 {strides = array<i32>} : memref<16x512xf32, #tpu.memory_space<vmem>>, vector<16x512xf32>,
    %c0_i32_8 = arith.constant 0 : i32
    %10 = arith.cmpi eq, %arg1, %c0_i32_8 : i32
    %11 = arith.extui %10 : i1 to i32
    %c0_i32_9 = arith.constant 0 : i32
    %12 = arith.cmpi ne, %11, %c0_i32_9 : i32
    scf.if %12 {
      %c0_10 = arith.constant 0 : index
      %c0_11 = arith.constant 0 : index
      %13 = vector.load %arg8[%c0_10, %c0_11] : memref<16x512xf32, #tpu.memory_space<vmem>>, vector<16x512xf32>
      %c0_12 = arith.constant 0 : index
      %c0_13 = arith.constant 0 : index
      %14 = vector.load %arg4[%c0_12, %c0_13] : memref<1x512xf32, #tpu.memory_space<vmem>>, vector<1x512xf32>
      %15 = vector.broadcast %14 : vector<1x512xf32> to vector<16x512xf32>
      %16 = arith.addf %13, %15 : vector<16x512xf32>
      %17 = arith.truncf %16 : vector<16x512xf32> to vector<16x512xbf16>
      %c0_14 = arith.constant 0 : index
      %c0_15 = arith.constant 0 : index
      %18 = vector.load %arg5[%c0_14, %c0_15] : memref<512x512xbf16, #tpu.memory_space<vmem>>, vector<512x512xbf16>
      %cst_16 = arith.constant dense<0.000000e+00> : vector<16x512xf32>
      %19 = tpu.matmul %17, %18, %cst_16 {dimension_numbers = #tpu.dot_dimension_numbers<[1], [0], [0], [1], [0, 0, 1, 1], [], []>} : vector<16x512xbf16>, vector<512x512xbf16>, vector<16x512xf32> -> vector<16x512xf32>
      %c0_17 = arith.constant 0 : index
      %c0_18 = arith.constant 0 : index
      %20 = vector.load %arg6[%c0_17, %c0_18] : memref<1x512xf32, #tpu.memory_space<vmem>>, vector<1x512xf32>
      %21 = vector.broadcast %20 : vector<1x512xf32> to vector<16x512xf32>
      %22 = arith.addf %19, %21 : vector<16x512xf32>
      %c0_19 = arith.constant 0 : index
      %c0_20 = arith.constant 0 : index
      %23 = vector.load %arg7[%c0_19, %c0_20] : memref<16x512xf32, #tpu.memory_space<vmem>>, vector<16x512xf32>
      tpu.vector_store %arg7[%c0_19, %c0_20], %22 {strides = array<i32>} : memref<16x512xf32, #tpu.memory_space<vmem>>, vector<16x512xf32>,
    } else {
    }
    return
  }
  func.func @transform_0(%arg0: i32, %arg1: i32) -> (i32, i32) {
    %c0_i32 = arith.constant 0 : i32
    return %arg0, %arg1 : i32, i32
  }
  func.func @transform_1(%arg0: i32, %arg1: i32) -> (i32, i32) {
    %c0_i32 = arith.constant 0 : i32
    %c0_i32_0 = arith.constant 0 : i32
    return %arg1, %c0_i32 : i32, i32
  }
  func.func @transform_2(%arg0: i32, %arg1: i32) -> (i32, i32) {
    %c0_i32 = arith.constant 0 : i32
    %c0_i32_0 = arith.constant 0 : i32
    %c0_i32_1 = arith.constant 0 : i32
    return %c0_i32, %c0_i32_0 : i32, i32
  }
  func.func @transform_3(%arg0: i32, %arg1: i32) -> (i32, i32) {
    %c0_i32 = arith.constant 0 : i32
    %c0_i32_0 = arith.constant 0 : i32
    %c0_i32_1 = arith.constant 0 : i32
    return %c0_i32, %c0_i32_0 : i32, i32
  }
  func.func @transform_4(%arg0: i32, %arg1: i32) -> (i32, i32) {
    %c0_i32 = arith.constant 0 : i32
    %c0_i32_0 = arith.constant 0 : i32
    %c0_i32_1 = arith.constant 0 : i32
    return %c0_i32, %c0_i32_0 : i32, i32
  }
  func.func @transform_5(%arg0: i32, %arg1: i32) -> (i32, i32) {
    %c0_i32 = arith.constant 0 : i32
    %c0_i32_0 = arith.constant 0 : i32
    return %arg0, %c0_i32 : i32, i32
  }
}

</mosaic_0001>

<bundles_post_ra>
// kernel: tpu_custom_call.1
= control target key start
LH: loop header
LB: loop body
LE: loop exit
PB: predicated region body
PF: predicated region fallthrough
CT: control target
= control target key end

     0   :  { %10 = vsyncpa [#allocation4], 0  ;;  %s2249_s0 = inlined_call_operand.hbm [shape: f32[16,32], index: 0, kind: input, shape index: {}]   ;;  %s2250_s1 = inlined_call_operand.hbm [shape: bf16[32,512], index: 1, kind: input, shape index: {}]   ;;  %s2251_s2 = inlined_call_operand.hbm [shape: f32[1,512], index: 2, kind: input, shape index: {}]   ;;  %s2252_s3 = inlined_call_operand.hbm [shape: bf16[512,512], index: 3, kind: input, shape index: {}]   ;;  %s2253_s4 = inlined_call_operand.hbm [shape: f32[1,512], index: 4, kind: input, shape index: {}]   ;;  %s2254_s5 = inlined_call_operand.hbm [shape: f32[16,512], index: 5, kind: output, shape index: {}]  }
   0x1   :  { %11 = vsyncpa [#allocation7], 0 }
   0x2   :  { %12 = vsyncpa [#allocation10], 0  ;;  %s31_s20 = sshll.u32 %s2250_s1, 4  ;;  %s32_s20 = int_to_ptr.hbm [resolvable:$true] %s31_s20 }
   0x3   :  { %13 = vsyncpa [#allocation5], 0  ;;  %s2155_s21 = smov [#allocation6]   ;;  %s55_s25 = sshll.u32 %s2252_s3, 4  ;;  %s56_s25 = int_to_ptr.hbm [resolvable:$true] %s55_s25 }
   0x4   :  { %s33_s22 = sshll.u32 %s2155_s21, 4  ;;  %s2156_s26 = smov 256   ;;  %s34_s22 = int_to_ptr.vmem [resolvable:$true] %s33_s22 }
   0x5   :  { %s2157_s27 = smov 16   ;;  %s2158_s28 = smov [#allocation9]  }
   0x6   :  { %39 = dma.hbm_to_vmem [thread:$0]  %s32_s20, 1024, %s34_s22, [#allocation7], %s2156_s26, %s2156_s26, %s2157_s27  }
   0x7   :  { %s57_s29 = sshll.u32 %s2158_s28, 4  ;;  %s18_s7 = sshll.u32 %s2249_s0, 4  ;;  %s58_s29 = int_to_ptr.vmem [resolvable:$true] %s57_s29  ;;  %s19_s7 = int_to_ptr.hbm [resolvable:$true] %s18_s7 }
   0x8   :  { %63 = dma.hbm_to_vmem [thread:$0]  %s56_s25, 16384, %s58_s29, [#allocation10], %s2156_s26, %s2156_s26, %s2157_s27  }
   0x9   :  { %s2159_s1 = smov [#allocation3]   ;;  %s45_s3 = sshll.u32 %s2251_s2, 4  ;;  %s46_s3 = int_to_ptr.hbm [resolvable:$true] %s45_s3 }
   0xa   :  { %s20_s8 = sshll.u32 %s2159_s1, 4  ;;  %s2160_s11 = smov 128   ;;  %s21_s8 = int_to_ptr.vmem [resolvable:$true] %s20_s8 }
   0xb   :  { %s2161_s12 = smov 8   ;;  %s2162_s13 = smov [#allocation8]  }
   0xc   :  { %26 = dma.hbm_to_vmem [thread:$0]  %s19_s7, 256, %s21_s8, [#allocation4], %s2160_s11, %s2160_s11, %s2161_s12  }
   0xd   :  { %s47_s14 = sshll.u32 %s2162_s13, 4  ;;  %s69_s0 = sshll.u32 %s2253_s4, 4  ;;  %s48_s14 = int_to_ptr.vmem [resolvable:$true] %s47_s14  ;;  %s70_s0 = int_to_ptr.hbm [resolvable:$true] %s69_s0 }
   0xe   :  { %50 = dma.hbm_to_vmem [thread:$0]  %s46_s3, 64, %s48_s14, [#allocation7]  }
   0xf   :  { %s2163_s17 = smov [#allocation11]  }
  0x10   :  { %s71_s18 = sshll.u32 %s2163_s17, 4  ;;  %s72_s18 = int_to_ptr.vmem [resolvable:$true] %s71_s18 }
  0x11   :  { %74 = dma.hbm_to_vmem [thread:$0]  %s70_s0, 64, %s72_s18, [#allocation10]  }
  0x12   :  { %2147 = dma.done.wait [#allocation4], 256  }
  0x13   :  { %2148 = vsyncadd [#allocation4], 4294967040 }
  0x14   :  { %2149 = dma.done.wait [#allocation7], 1088  }
  0x15   :  { %2150 = vsyncadd [#allocation7], 4294966208 }
  0x16   :  { %2151 = dma.done.wait [#allocation10], 16448  }
  0x17   :  { %2152 = vsyncadd [#allocation10], 4294950848  ;;  %v1325_v0 = vld [vmem:[#allocation6 + $0x20] sm:$0xf]  ;;  %v1861_v1 = vld [vmem:[#allocation6 + $0x2c] sm:$0xf0] }
  0x18   :  { %v1859_v2 = vld [vmem:[#allocation6 + $0x24] sm:$0xf]  ;;  %v1326_v3 = vor.u32 %v1861_v1, %v1325_v0  ;;  %v1327_v4 = vld [vmem:[#allocation6 + $0x30] sm:$0xf0]  ;;  %v1333_v5 = vld [vmem:[#allocation6 + $0x28] sm:$0xf] }
  0x19   :  { %v1862_v6 = vld [vmem:[#allocation6 + $0x34] sm:$0xf0]  ;;  %v1330_v7 = vor.u32 %v1859_v2, %v1327_v4  ;;  %v1860_v9 = vld [vmem:[#allocation6 + $0x2c] sm:$0xf]  ;;  %v1335_v10 = vld [vmem:[#allocation6 + $0x38] sm:$0xf0] }
  0x1a   :  { %v1334_v8 = vor.u32 %v1862_v6, %v1333_v5  ;;  %v1309_v11 = vld [vmem:[#allocation6] sm:$0xf]  ;;  %177 = vmatpush.bf16.msra.mxu0 %v1326_v3  ;;  %v1338_v12 = vor.u32 %v1860_v9, %v1335_v10  ;;  %v1857_v13 = vld [vmem:[#allocation6 + $0xc] sm:$0xf0]  ;;  %v1855_v14 = vld [vmem:[#allocation6 + $0x4] sm:$0xf] }
  0x1b   :  { %v1311_v15 = vld [vmem:[#allocation6 + $0x10] sm:$0xf0]  ;;  %191 = vmatpush.bf16.msra.mxu1 %v1330_v7  ;;  %v1310_v16 = vor.u32 %v1857_v13, %v1309_v11  ;;  %v1317_v18 = vld [vmem:[#allocation6 + $0x8] sm:$0xf]  ;;  %v1858_v19 = vld [vmem:[#allocation6 + $0x14] sm:$0xf0] }
  0x1c   :  { %205 = vmatpush.bf16.msra.mxu2 %v1334_v8  ;;  %v1314_v17 = vor.u32 %v1855_v14, %v1311_v15  ;;  %v1856_v20 = vld [vmem:[#allocation6 + $0xc] sm:$0xf]  ;;  %219 = vmatpush.bf16.msra.mxu3 %v1338_v12  ;;  %v1318_v21 = vor.u32 %v1858_v19, %v1317_v18  ;;  %v1319_v22 = vld [vmem:[#allocation6 + $0x18] sm:$0xf0]  ;;  %v116_v23 = vld [vmem:[#allocation3] sm:$0xff]  ;;  %vm167_vm0 = vcmask 261120  }
  0x1d   :  { %v117_v24 = vld [vmem:[#allocation3 + $0x8] sm:$0xff]  ;;  %v1322_v25 = vor.u32 %v1856_v20, %v1319_v22  ;;  %v1457_v27 = vld [vmem:[#allocation9 + $0xe0] sm:$0xf]  ;;  %v1893_v28 = vld [vmem:[#allocation9 + $0xec] sm:$0xf0]  ;;  %s2164_s2 = smov [#allocation12]  }
  0x1e   :  { %v118_v26 = vpack.c.bf16 %v117_v24, %v116_v23  ;;  %v1585_v29 = vld [vmem:[#allocation9 + $0x1e0] sm:$0xf]  ;;  %178 = vmatpush.bf16.msra.mxu0 %v1310_v16  ;;  %v1458_v30 = vor.u32 %v1893_v28, %v1457_v27  ;;  %v1925_v31 = vld [vmem:[#allocation9 + $0x1ec] sm:$0xf0]  ;;  %s1290_s4 = sshll.u32 %s2164_s2, 4  ;;  %s1292_s21 = sshll.u32 %s2254_s5, 4  ;;  %s1291_s4 = int_to_ptr.vmem [resolvable:$true] %s1290_s4  ;;  %s1293_s21 = int_to_ptr.hbm [resolvable:$true] %s1292_s21 }
  0x1f   :  { %v1441_v32 = vld [vmem:[#allocation9 + $0xc0] sm:$0xf]  ;;  %v1889_v33 = vld [vmem:[#allocation9 + $0xcc] sm:$0xf0]  ;;  %192 = vmatpush.bf16.msra.mxu1 %v1314_v17  ;;  %v1586_v34 = vor.u32 %v1925_v31, %v1585_v29  ;;  %s2165_s22 = smov 512   ;;  %s2166_s23 = smov 32  }
  0x20   :  { %206 = vmatpush.bf16.msra.mxu2 %v1318_v21  ;;  %v1569_v35 = vld [vmem:[#allocation9 + $0x1c0] sm:$0xf]  ;;  %v1921_v36 = vld [vmem:[#allocation9 + $0x1cc] sm:$0xf0]  ;;  %220 = vmatpush.bf16.msra.mxu3 %v1322_v25  ;;  %v1442_v38 = vor.u32 %v1889_v33, %v1441_v32 }
  0x21   :  { %v1713_v37 = vld [vmem:[#allocation9 + $0x2e0] sm:$0xf]  ;;  %v1957_v39 = vld [vmem:[#allocation9 + $0x2ec] sm:$0xf0]  ;;  %1339 = vmatmul.msk.bf16.vlgmr.msra.gmra.mxu0 %vm167_vm0, %v118_v26  ;;  %v1570_v42 = vor.u32 %v1921_v36, %v1569_v35 }
  0x22   :  { %1054 = vmatpush.bf16.msrb.mxu0 %v1458_v30  ;;  %v1841_v40 = vld [vmem:[#allocation9 + $0x3e0] sm:$0xf]  ;;  %v1989_v41 = vld [vmem:[#allocation9 + $0x3ec] sm:$0xf0]  ;;  %v1714_v43 = vor.u32 %v1957_v39, %v1713_v37  ;;  %1340 = vmatmul.msk.bf16.vlgmr.msra.gmra.mxu1 %vm167_vm0, %v118_v26 }
  0x23   :  { %1068 = vmatpush.bf16.msrb.mxu1 %v1586_v34  ;;  %v1842_v44 = vor.u32 %v1989_v41, %v1841_v40  ;;  %v1425_v45 = vld [vmem:[#allocation9 + $0xa0] sm:$0xf]  ;;  %v1885_v46 = vld [vmem:[#allocation9 + $0xac] sm:$0xf0]  ;;  %1341 = vmatmul.msk.bf16.vlgmr.msra.gmra.mxu2 %vm167_vm0, %v118_v26 }
  0x24   :  { %v1553_v47 = vld [vmem:[#allocation9 + $0x1a0] sm:$0xf]  ;;  %v1917_v48 = vld [vmem:[#allocation9 + $0x1ac] sm:$0xf0]  ;;  %1342 = vmatmul.msk.bf16.vlgmr.msra.gmra.mxu3 %vm167_vm0, %v118_v26  ;;  %1082 = vmatpush.bf16.msrb.mxu2 %v1714_v43  ;;  %v1426_v54 = vor.u32 %v1885_v46, %v1425_v45 }
  0x25   :  { %v1697_v49 = vld [vmem:[#allocation9 + $0x2c0] sm:$0xf]  ;;  %v1953_v50 = vld [vmem:[#allocation9 + $0x2cc] sm:$0xf0]  ;;  %1096 = vmatpush.bf16.msrb.mxu3 %v1842_v44  ;;  %v1554_v58 = vor.u32 %v1917_v48, %v1553_v47 }
  0x26   :  { %v1698_v51 = vor.u32 %v1953_v50, %v1697_v49  ;;  %v1825_v52 = vld [vmem:[#allocation9 + $0x3c0] sm:$0xf]  ;;  %v1985_v53 = vld [vmem:[#allocation9 + $0x3cc] sm:$0xf0]  ;;  %1055 = vmatpush.bf16.msrb.mxu0 %v1442_v38  ;;  %v1891_v49 = vld [vmem:[#allocation9 + $0xe4] sm:$0xf] }
  0x27   :  { %v1826_v55 = vor.u32 %v1985_v53, %v1825_v52  ;;  %v1409_v56 = vld [vmem:[#allocation9 + $0x80] sm:$0xf]  ;;  %v1881_v57 = vld [vmem:[#allocation9 + $0x8c] sm:$0xf0]  ;;  %1069 = vmatpush.bf16.msrb.mxu1 %v1570_v42  ;;  %v1459_v50 = vld [vmem:[#allocation9 + $0xf0] sm:$0xf0] }
  0x28   :  { %v1681_v59 = vld [vmem:[#allocation9 + $0x2a0] sm:$0xf]  ;;  %v1949_v60 = vld [vmem:[#allocation9 + $0x2ac] sm:$0xf0]  ;;  %1083 = vmatpush.bf16.msrb.mxu2 %v1698_v51  ;;  %v1410_v2 = vor.u32 %v1881_v57, %v1409_v56  ;;  %v1923_v51 = vld [vmem:[#allocation9 + $0x1e4] sm:$0xf] }
  0x29   :  { %v1809_v61 = vld [vmem:[#allocation9 + $0x3a0] sm:$0xf]  ;;  %v1913_v63 = vld [vmem:[#allocation9 + $0x18c] sm:$0xf0]  ;;  %v1682_v1 = vor.u32 %v1949_v60, %v1681_v59  ;;  %1097 = vmatpush.bf16.msrb.mxu3 %v1826_v55  ;;  %v1587_v52 = vld [vmem:[#allocation9 + $0x1f0] sm:$0xf0] }
  0x2a   :  { %v1537_v62 = vld [vmem:[#allocation9 + $0x180] sm:$0xf]  ;;  %v1981_v0 = vld [vmem:[#allocation9 + $0x3ac] sm:$0xf0]  ;;  %1056 = vmatpush.bf16.msrb.mxu0 %v1426_v54  ;;  %v1887_v56 = vld [vmem:[#allocation9 + $0xc4] sm:$0xf] }
  0x2b   :  { %v1810_v3 = vor.u32 %v1981_v0, %v1809_v61  ;;  %v1393_v4 = vld [vmem:[#allocation9 + $0x60] sm:$0xf]  ;;  %v1945_v6 = vld [vmem:[#allocation9 + $0x28c] sm:$0xf0]  ;;  %1070 = vmatpush.bf16.msrb.mxu1 %v1554_v58  ;;  %v1538_v7 = vor.u32 %v1913_v63, %v1537_v62  ;;  %v1462_v61 = vor.u32 %v1891_v49, %v1459_v50  ;;  %v1955_v63 = vld [vmem:[#allocation9 + $0x2e4] sm:$0xf] }
  0x2c   :  { %v1665_v5 = vld [vmem:[#allocation9 + $0x280] sm:$0xf]  ;;  %v1877_v8 = vld [vmem:[#allocation9 + $0x6c] sm:$0xf0]  ;;  %1084 = vmatpush.bf16.msrb.mxu2 %v1682_v1  ;;  %v1715_v0 = vld [vmem:[#allocation9 + $0x2f0] sm:$0xf0]  ;;  %v1590_v1 = vor.u32 %v1923_v51, %v1587_v52 }
  0x2d   :  { %v1793_v9 = vld [vmem:[#allocation9 + $0x380] sm:$0xf]  ;;  %v1977_v10 = vld [vmem:[#allocation9 + $0x38c] sm:$0xf0]  ;;  %v1666_v13 = vor.u32 %v1945_v6, %v1665_v5  ;;  %1098 = vmatpush.bf16.msrb.mxu3 %v1810_v3  ;;  %v1394_v14 = vor.u32 %v1877_v8, %v1393_v4  ;;  %v1987_v3 = vld [vmem:[#allocation9 + $0x3e4] sm:$0xf] }
  0x2e   :  { %v1521_v11 = vld [vmem:[#allocation9 + $0x160] sm:$0xf]  ;;  %v1909_v12 = vld [vmem:[#allocation9 + $0x16c] sm:$0xf0]  ;;  %1057 = vmatpush.bf16.msrb.mxu0 %v1410_v2  ;;  %v1794_v15 = vor.u32 %v1977_v10, %v1793_v9  ;;  %v1443_v2 = vld [vmem:[#allocation9 + $0xd0] sm:$0xf0]  ;;  %v1718_v9 = vor.u32 %v1955_v63, %v1715_v0 }
  0x2f   :  { %v1377_v16 = vld [vmem:[#allocation9 + $0x40] sm:$0xf]  ;;  %v1941_v18 = vld [vmem:[#allocation9 + $0x26c] sm:$0xf0]  ;;  %1071 = vmatpush.bf16.msrb.mxu1 %v1538_v7  ;;  %v1522_v19 = vor.u32 %v1909_v12, %v1521_v11  ;;  %v1843_v4 = vld [vmem:[#allocation9 + $0x3f0] sm:$0xf0]  ;;  %v1446_v10 = vor.u32 %v1887_v56, %v1443_v2 }
  0x30   :  { %v1649_v17 = vld [vmem:[#allocation9 + $0x260] sm:$0xf]  ;;  %v1873_v20 = vld [vmem:[#allocation9 + $0x4c] sm:$0xf0]  ;;  %1085 = vmatpush.bf16.msrb.mxu2 %v1666_v13  ;;  %v1919_v5 = vld [vmem:[#allocation9 + $0x1c4] sm:$0xf]  ;;  %v1846_v11 = vor.u32 %v1987_v3, %v1843_v4 }
  0x31   :  { %v1777_v21 = vld [vmem:[#allocation9 + $0x360] sm:$0xf]  ;;  %v1973_v22 = vld [vmem:[#allocation9 + $0x36c] sm:$0xf0]  ;;  %v1650_v25 = vor.u32 %v1941_v18, %v1649_v17  ;;  %1099 = vmatpush.bf16.msrb.mxu3 %v1794_v15  ;;  %v1378_v26 = vor.u32 %v1873_v20, %v1377_v16  ;;  %v1571_v6 = vld [vmem:[#allocation9 + $0x1d0] sm:$0xf0] }
  0x32   :  { %v1505_v23 = vld [vmem:[#allocation9 + $0x140] sm:$0xf]  ;;  %v1905_v24 = vld [vmem:[#allocation9 + $0x14c] sm:$0xf0]  ;;  %1058 = vmatpush.bf16.msrb.mxu0 %v1394_v14  ;;  %v1778_v27 = vor.u32 %v1973_v22, %v1777_v21  ;;  %v1883_v12 = vld [vmem:[#allocation9 + $0xa4] sm:$0xf]  ;;  %v1574_v15 = vor.u32 %v1919_v5, %v1571_v6 }
  0x33   :  { %v1361_v28 = vld [vmem:[#allocation9 + $0x20] sm:$0xf]  ;;  %v1937_v30 = vld [vmem:[#allocation9 + $0x24c] sm:$0xf0]  ;;  %1072 = vmatpush.bf16.msrb.mxu1 %v1522_v19  ;;  %v1506_v31 = vor.u32 %v1905_v24, %v1505_v23  ;;  %v1951_v13 = vld [vmem:[#allocation9 + $0x2c4] sm:$0xf] }
  0x34   :  { %v1633_v29 = vld [vmem:[#allocation9 + $0x240] sm:$0xf]  ;;  %v1869_v32 = vld [vmem:[#allocation9 + $0x2c] sm:$0xf0]  ;;  %1086 = vmatpush.bf16.msrb.mxu2 %v1650_v25  ;;  %v1699_v14 = vld [vmem:[#allocation9 + $0x2d0] sm:$0xf0] }
  0x35   :  { %v1761_v33 = vld [vmem:[#allocation9 + $0x340] sm:$0xf]  ;;  %v1969_v34 = vld [vmem:[#allocation9 + $0x34c] sm:$0xf0]  ;;  %v1634_v37 = vor.u32 %v1937_v30, %v1633_v29  ;;  %1100 = vmatpush.bf16.msrb.mxu3 %v1778_v27  ;;  %v1362_v39 = vor.u32 %v1869_v32, %v1361_v28  ;;  %v1427_v16 = vld [vmem:[#allocation9 + $0xb0] sm:$0xf0]  ;;  %v1702_v21 = vor.u32 %v1951_v13, %v1699_v14 }
  0x36   :  { %v1489_v35 = vld [vmem:[#allocation9 + $0x120] sm:$0xf]  ;;  %v1901_v36 = vld [vmem:[#allocation9 + $0x12c] sm:$0xf0]  ;;  %1059 = vmatpush.bf16.msrb.mxu0 %v1378_v26  ;;  %v1762_v40 = vor.u32 %v1969_v34, %v1761_v33  ;;  %v1983_v17 = vld [vmem:[#allocation9 + $0x3c4] sm:$0xf]  ;;  %v1430_v22 = vor.u32 %v1883_v12, %v1427_v16 }
  0x37   :  { %v1345_v38 = vld [vmem:[#allocation9] sm:$0xf]  ;;  %v1865_v41 = vld [vmem:[#allocation9 + $0xc] sm:$0xf0]  ;;  %1073 = vmatpush.bf16.msrb.mxu1 %v1506_v31  ;;  %v1490_v44 = vor.u32 %v1901_v36, %v1489_v35  ;;  %v1827_v18 = vld [vmem:[#allocation9 + $0x3d0] sm:$0xf0] }
  0x38   :  { %v1617_v42 = vld [vmem:[#allocation9 + $0x220] sm:$0xf]  ;;  %v1933_v43 = vld [vmem:[#allocation9 + $0x22c] sm:$0xf0]  ;;  %1087 = vmatpush.bf16.msrb.mxu2 %v1634_v37  ;;  %v1346_v54 = vor.u32 %v1865_v41, %v1345_v38  ;;  %v1915_v19 = vld [vmem:[#allocation9 + $0x1a4] sm:$0xf]  ;;  %v1830_v23 = vor.u32 %v1983_v17, %v1827_v18 }
  0x39   :  { %v1473_v45 = vld [vmem:[#allocation9 + $0x100] sm:$0xf]  ;;  %v1965_v47 = vld [vmem:[#allocation9 + $0x32c] sm:$0xf0]  ;;  %v1618_v53 = vor.u32 %v1933_v43, %v1617_v42  ;;  %1101 = vmatpush.bf16.msrb.mxu3 %v1762_v40  ;;  %v1555_v20 = vld [vmem:[#allocation9 + $0x1b0] sm:$0xf0] }
  0x3a   :  { %v1745_v46 = vld [vmem:[#allocation9 + $0x320] sm:$0xf]  ;;  %v1897_v48 = vld [vmem:[#allocation9 + $0x10c] sm:$0xf0]  ;;  %1060 = vmatpush.bf16.msrb.mxu0 %v1362_v39  ;;  %v1879_v24 = vld [vmem:[#allocation9 + $0x84] sm:$0xf]  ;;  %v1558_v27 = vor.u32 %v1915_v19, %v1555_v20 }
  0x3b   :  { %v1746_v55 = vor.u32 %v1965_v47, %v1745_v46  ;;  %v1601_v57 = vld [vmem:[#allocation9 + $0x200] sm:$0xf]  ;;  %v1929_v58 = vld [vmem:[#allocation9 + $0x20c] sm:$0xf0]  ;;  %1074 = vmatpush.bf16.msrb.mxu1 %v1490_v44  ;;  %v1474_v60 = vor.u32 %v1897_v48, %v1473_v45  ;;  %v1947_v25 = vld [vmem:[#allocation9 + $0x2a4] sm:$0xf] }
  0x3c   :  { %v1729_v59 = vld [vmem:[#allocation9 + $0x300] sm:$0xf]  ;;  %v1961_v62 = vld [vmem:[#allocation9 + $0x30c] sm:$0xf0]  ;;  %1088 = vmatpush.bf16.msrb.mxu2 %v1618_v53  ;;  %v1602_v7 = vor.u32 %v1929_v58, %v1601_v57  ;;  %v1683_v26 = vld [vmem:[#allocation9 + $0x2b0] sm:$0xf0] }
  0x3d   :  { %1102 = vmatpush.bf16.msrb.mxu3 %v1746_v55  ;;  %v1730_v8 = vor.u32 %v1961_v62, %v1729_v59  ;;  %v1411_v28 = vld [vmem:[#allocation9 + $0x90] sm:$0xf0]  ;;  %v1979_v29 = vld [vmem:[#allocation9 + $0x3a4] sm:$0xf]  ;;  %v1686_v33 = vor.u32 %v1947_v25, %v1683_v26 }
  0x3e   :  { %1061 = vmatpush.bf16.msrb.mxu0 %v1346_v54  ;;  %v1811_v30 = vld [vmem:[#allocation9 + $0x3b0] sm:$0xf0]  ;;  %v1911_v31 = vld [vmem:[#allocation9 + $0x184] sm:$0xf]  ;;  %v1414_v34 = vor.u32 %v1879_v24, %v1411_v28 }
  0x3f   :  { %1075 = vmatpush.bf16.msrb.mxu1 %v1474_v60  ;;  %v1539_v32 = vld [vmem:[#allocation9 + $0x190] sm:$0xf0]  ;;  %v1814_v35 = vor.u32 %v1979_v29, %v1811_v30  ;;  %v1875_v37 = vld [vmem:[#allocation9 + $0x64] sm:$0xf]  ;;  %v254_v29 = vld [vmem:[#allocation8] sm:$0xf] }
  0x40   :  { %1089 = vmatpush.bf16.msrb.mxu2 %v1602_v7  ;;  %v1542_v36 = vor.u32 %v1911_v31, %v1539_v32  ;;  %v1395_v38 = vld [vmem:[#allocation9 + $0x70] sm:$0xf0]  ;;  %v1907_v39 = vld [vmem:[#allocation9 + $0x164] sm:$0xf]  ;;  %v256_v30 = vperm.slane %v254_v29, 0  ;;  %v257_v31 = vperm.slane %v254_v29, 1 }
  0x41   :  { %1103 = vmatpush.bf16.msrb.mxu3 %v1730_v8  ;;  %v1398_v40 = vor.u32 %v1875_v37, %v1395_v38  ;;  %v1523_v41 = vld [vmem:[#allocation9 + $0x170] sm:$0xf0]  ;;  %v1943_v43 = vld [vmem:[#allocation9 + $0x284] sm:$0xf] }
  0x42   :  { %1110 = vmatpush.bf16.msra.mxu0 %v1462_v61  ;;  %v1526_v42 = vor.u32 %v1907_v39, %v1523_v41  ;;  %v1667_v44 = vld [vmem:[#allocation9 + $0x290] sm:$0xf0]  ;;  %v1975_v46 = vld [vmem:[#allocation9 + $0x384] sm:$0xf]  ;;  %v1593_v39 = vld [vmem:[#allocation9 + $0x1e8] sm:$0xf] }
  0x43   :  { %1124 = vmatpush.bf16.msra.mxu1 %v1590_v1  ;;  %v1670_v45 = vor.u32 %v1943_v43, %v1667_v44  ;;  %v1795_v47 = vld [vmem:[#allocation9 + $0x390] sm:$0xf0]  ;;  %v1871_v48 = vld [vmem:[#allocation9 + $0x44] sm:$0xf] }
  0x44   :  { %1138 = vmatpush.bf16.msra.mxu2 %v1718_v9  ;;  %v1798_v49 = vor.u32 %v1975_v46, %v1795_v47  ;;  %v1379_v50 = vld [vmem:[#allocation9 + $0x50] sm:$0xf0]  ;;  %v1903_v51 = vld [vmem:[#allocation9 + $0x144] sm:$0xf]  ;;  %v1449_v47 = vld [vmem:[#allocation9 + $0xc8] sm:$0xf] }
  0x45   :  { %1152 = vmatpush.bf16.msra.mxu3 %v1846_v11  ;;  %v1507_v52 = vld [vmem:[#allocation9 + $0x150] sm:$0xf0]  ;;  %v1382_v53 = vor.u32 %v1871_v48, %v1379_v50  ;;  %v1939_v55 = vld [vmem:[#allocation9 + $0x264] sm:$0xf]  ;;  %v1890_v48 = vld [vmem:[#allocation9 + $0xd4] sm:$0xf0] }
  0x46   :  { %1111 = vmatpush.bf16.msra.mxu0 %v1446_v10  ;;  %v1510_v54 = vor.u32 %v1903_v51, %v1507_v52  ;;  %v1651_v56 = vld [vmem:[#allocation9 + $0x270] sm:$0xf0]  ;;  %v1971_v57 = vld [vmem:[#allocation9 + $0x364] sm:$0xf]  ;;  %v1577_v51 = vld [vmem:[#allocation9 + $0x1c8] sm:$0xf] }
  0x47   :  { %1125 = vmatpush.bf16.msra.mxu1 %v1574_v15  ;;  %v1654_v58 = vor.u32 %v1939_v55, %v1651_v56  ;;  %v1779_v59 = vld [vmem:[#allocation9 + $0x370] sm:$0xf0]  ;;  %v1867_v61 = vld [vmem:[#allocation9 + $0x24] sm:$0xf]  ;;  %v1922_v52 = vld [vmem:[#allocation9 + $0x1d4] sm:$0xf0] }
  0x48   :  { %1139 = vmatpush.bf16.msra.mxu2 %v1702_v21  ;;  %v1782_v60 = vor.u32 %v1971_v57, %v1779_v59  ;;  %v1363_v62 = vld [vmem:[#allocation9 + $0x30] sm:$0xf0]  ;;  %v1899_v0 = vld [vmem:[#allocation9 + $0x124] sm:$0xf]  ;;  %v1721_v55 = vld [vmem:[#allocation9 + $0x2e8] sm:$0xf]  ;;  %v1578_v59 = vor.u32 %v1922_v52, %v1577_v51 }
  0x49   :  { %1153 = vmatpush.bf16.msra.mxu3 %v1830_v23  ;;  %v1366_v63 = vor.u32 %v1867_v61, %v1363_v62  ;;  %v1491_v1 = vld [vmem:[#allocation9 + $0x130] sm:$0xf0]  ;;  %v1935_v3 = vld [vmem:[#allocation9 + $0x244] sm:$0xf]  ;;  %v1958_v56 = vld [vmem:[#allocation9 + $0x2f4] sm:$0xf0] }
  0x4a   :  { %1112 = vmatpush.bf16.msra.mxu0 %v1430_v22  ;;  %v1494_v2 = vor.u32 %v1899_v0, %v1491_v1  ;;  %v1635_v4 = vld [vmem:[#allocation9 + $0x250] sm:$0xf0]  ;;  %v1967_v5 = vld [vmem:[#allocation9 + $0x344] sm:$0xf]  ;;  %v1849_v57 = vld [vmem:[#allocation9 + $0x3e8] sm:$0xf] }
  0x4b   :  { %1126 = vmatpush.bf16.msra.mxu1 %v1558_v27  ;;  %v1638_v6 = vor.u32 %v1935_v3, %v1635_v4  ;;  %v1763_v7 = vld [vmem:[#allocation9 + $0x350] sm:$0xf0]  ;;  %v1863_v9 = vld [vmem:[#allocation9 + $0x4] sm:$0xf]  ;;  %v1433_v61 = vld [vmem:[#allocation9 + $0xa8] sm:$0xf] }
  0x4c   :  { %1140 = vmatpush.bf16.msra.mxu2 %v1686_v33  ;;  %v1766_v8 = vor.u32 %v1967_v5, %v1763_v7  ;;  %v1347_v10 = vld [vmem:[#allocation9 + $0x10] sm:$0xf0]  ;;  %v1895_v11 = vld [vmem:[#allocation9 + $0x104] sm:$0xf]  ;;  %v1886_v62 = vld [vmem:[#allocation9 + $0xb4] sm:$0xf0] }
  0x4d   :  { %1154 = vmatpush.bf16.msra.mxu3 %v1814_v35  ;;  %v1350_v12 = vor.u32 %v1863_v9, %v1347_v10  ;;  %v1475_v13 = vld [vmem:[#allocation9 + $0x110] sm:$0xf0]  ;;  %v1931_v15 = vld [vmem:[#allocation9 + $0x224] sm:$0xf]  ;;  %v1894_v35 = vld [vmem:[#allocation9 + $0xf4] sm:$0xf0]  ;;  %v1434_v9 = vor.u32 %v1886_v62, %v1433_v61 }
  0x4e   :  { %1113 = vmatpush.bf16.msra.mxu0 %v1414_v34  ;;  %v1478_v14 = vor.u32 %v1895_v11, %v1475_v13  ;;  %v1619_v16 = vld [vmem:[#allocation9 + $0x230] sm:$0xf0]  ;;  %v1963_v17 = vld [vmem:[#allocation9 + $0x324] sm:$0xf]  ;;  %v1465_v34 = vld [vmem:[#allocation9 + $0xe8] sm:$0xf] }
  0x4f   :  { %1127 = vmatpush.bf16.msra.mxu1 %v1542_v36  ;;  %v1747_v18 = vld [vmem:[#allocation9 + $0x330] sm:$0xf0]  ;;  %v1622_v19 = vor.u32 %v1931_v15, %v1619_v16  ;;  %v1927_v21 = vld [vmem:[#allocation9 + $0x204] sm:$0xf]  ;;  %v1466_v44 = vor.u32 %v1894_v35, %v1465_v34  ;;  %v1918_v3 = vld [vmem:[#allocation9 + $0x1b4] sm:$0xf0] }
  0x50   :  { %1141 = vmatpush.bf16.msra.mxu2 %v1670_v45  ;;  %v1750_v20 = vor.u32 %v1963_v17, %v1747_v18  ;;  %v1603_v22 = vld [vmem:[#allocation9 + $0x210] sm:$0xf0]  ;;  %v1959_v24 = vld [vmem:[#allocation9 + $0x304] sm:$0xf]  ;;  %v1705_v10 = vld [vmem:[#allocation9 + $0x2c8] sm:$0xf] }
  0x51   :  { %1155 = vmatpush.bf16.msra.mxu3 %v1798_v49  ;;  %v1606_v23 = vor.u32 %v1927_v21, %v1603_v22  ;;  %v1731_v25 = vld [vmem:[#allocation9 + $0x310] sm:$0xf0]  ;;  %v258_v49 = vperm.slane %v254_v29, 2  ;;  %v1954_v11 = vld [vmem:[#allocation9 + $0x2d4] sm:$0xf0] }
  0x52   :  { %1114 = vmatpush.bf16.msra.mxu0 %v1398_v40  ;;  %v1734_v26 = vor.u32 %v1959_v24, %v1731_v25  ;;  %v1926_v40 = vld [vmem:[#allocation9 + $0x1f4] sm:$0xf0]  ;;  %v1417_v16 = vld [vmem:[#allocation9 + $0x88] sm:$0xf] }
  0x53   :  { %1128 = vmatpush.bf16.msra.mxu1 %v1526_v42  ;;  %v1594_v46 = vor.u32 %v1926_v40, %v1593_v39  ;;  %v1986_v15 = vld [vmem:[#allocation9 + $0x3d4] sm:$0xf0]  ;;  %v1545_v18 = vld [vmem:[#allocation9 + $0x188] sm:$0xf] }
  0x54   :  { %1142 = vmatpush.bf16.msra.mxu2 %v1654_v58  ;;  %v1882_v17 = vld [vmem:[#allocation9 + $0x94] sm:$0xf0]  ;;  %v1673_v34 = vld [vmem:[#allocation9 + $0x288] sm:$0xf] }
  0x55   :  { %1156 = vmatpush.bf16.msra.mxu3 %v1782_v60  ;;  %v1990_v60 = vld [vmem:[#allocation9 + $0x3f4] sm:$0xf0]  ;;  %v1418_v22 = vor.u32 %v1882_v17, %v1417_v16  ;;  %v1385_v40 = vld [vmem:[#allocation9 + $0x48] sm:$0xf] }
  0x56   :  { %1115 = vmatpush.bf16.msra.mxu0 %v1382_v53  ;;  %v259_v53 = vperm.slane %v254_v29, 3  ;;  %v1950_v24 = vld [vmem:[#allocation9 + $0x2b4] sm:$0xf0]  ;;  %v1785_v52 = vld [vmem:[#allocation9 + $0x368] sm:$0xf] }
  0x57   :  { %1129 = vmatpush.bf16.msra.mxu1 %v1510_v54  ;;  %v1450_v54 = vor.u32 %v1890_v48, %v1449_v47  ;;  %v1878_v29 = vld [vmem:[#allocation9 + $0x74] sm:$0xf0]  ;;  %v1657_v47 = vld [vmem:[#allocation9 + $0x268] sm:$0xf] }
  0x58   :  { %1143 = vmatpush.bf16.msra.mxu2 %v1638_v6  ;;  %v1722_v6 = vor.u32 %v1958_v56, %v1721_v55  ;;  %v1946_v35 = vld [vmem:[#allocation9 + $0x294] sm:$0xf0]  ;;  %v1497_v56 = vld [vmem:[#allocation9 + $0x128] sm:$0xf] }
  0x59   :  { %1157 = vmatpush.bf16.msra.mxu3 %v1766_v8  ;;  %v1850_v8 = vor.u32 %v1990_v60, %v1849_v57  ;;  %v1978_v39 = vld [vmem:[#allocation9 + $0x394] sm:$0xf0]  ;;  %v1641_v60 = vld [vmem:[#allocation9 + $0x248] sm:$0xf] }
  0x5a   :  { %1116 = vmatpush.bf16.msra.mxu0 %v1366_v63  ;;  %v1942_v48 = vld [vmem:[#allocation9 + $0x274] sm:$0xf0]  ;;  %v1769_v62 = vld [vmem:[#allocation9 + $0x348] sm:$0xf] }
  0x5b   :  { %1130 = vmatpush.bf16.msra.mxu1 %v1494_v2  ;;  %v1561_v2 = vld [vmem:[#allocation9 + $0x1a8] sm:$0xf]  ;;  %v1870_v55 = vld [vmem:[#allocation9 + $0x34] sm:$0xf0] }
  0x5c   :  { %1144 = vmatpush.bf16.msra.mxu2 %v1622_v19  ;;  %v1914_v19 = vld [vmem:[#allocation9 + $0x194] sm:$0xf0] }
  0x5d   :  { %1158 = vmatpush.bf16.msra.mxu3 %v1750_v20  ;;  %v1706_v20 = vor.u32 %v1954_v11, %v1705_v10  ;;  %v1546_v25 = vor.u32 %v1914_v19, %v1545_v18  ;;  %v1902_v57 = vld [vmem:[#allocation9 + $0x134] sm:$0xf0]  ;;  %v1924_v10 = vld [vmem:[#allocation9 + $0x1ec] sm:$0xf]  ;;  %v1595_v11 = vld [vmem:[#allocation9 + $0x1f8] sm:$0xf0] }
  0x5e   :  { %1117 = vmatpush.bf16.msra.mxu0 %v1350_v12  ;;  %v1833_v12 = vld [vmem:[#allocation9 + $0x3c8] sm:$0xf]  ;;  %v1938_v61 = vld [vmem:[#allocation9 + $0x254] sm:$0xf0] }
  0x5f   :  { %1131 = vmatpush.bf16.msra.mxu1 %v1478_v14  ;;  %v1562_v14 = vor.u32 %v1918_v3, %v1561_v2  ;;  %v1834_v21 = vor.u32 %v1986_v15, %v1833_v12  ;;  %v1353_v2 = vld [vmem:[#allocation9 + $0x8] sm:$0xf]  ;;  %v1866_v3 = vld [vmem:[#allocation9 + $0x14] sm:$0xf0] }
  0x60   :  { %1145 = vmatpush.bf16.msra.mxu2 %v1606_v23  ;;  %v1689_v23 = vld [vmem:[#allocation9 + $0x2a8] sm:$0xf]  ;;  %v1934_v15 = vld [vmem:[#allocation9 + $0x234] sm:$0xf0]  ;;  %v1354_v16 = vor.u32 %v1866_v3, %v1353_v2  ;;  %v1876_v2 = vld [vmem:[#allocation9 + $0x6c] sm:$0xf] }
  0x61   :  { %1159 = vmatpush.bf16.msra.mxu3 %v1734_v26  ;;  %v1817_v26 = vld [vmem:[#allocation9 + $0x3a8] sm:$0xf]  ;;  %v1966_v19 = vld [vmem:[#allocation9 + $0x334] sm:$0xf0]  ;;  %v1403_v3 = vld [vmem:[#allocation9 + $0x78] sm:$0xf0] }
  0x62   :  { %v1753_v18 = vld [vmem:[#allocation9 + $0x328] sm:$0xf] }
  0x9e   :  { %v180_v27 = vpop.f32.mrf.mxu0 }
  0x9f   :  { %v194_v28 = vpop.f32.mrf.mxu1  ;;  %v264_v32 = vadd.f32 %v256_v30, %v180_v27  ;;  %v1982_v27 = vld [vmem:[#allocation9 + $0x3b4] sm:$0xf0] }
  0xa0   :  { %v265_v36 = vadd.f32 %v257_v31, %v194_v28  ;;  %v1401_v28 = vld [vmem:[#allocation9 + $0x68] sm:$0xf] }
  0xa6   :  { %v208_v33 = vpop.f32.mrf.mxu2  ;;  %v182_v38 = vpop.f32.mrf.mxu0 }
  0xa7   :  { %v222_v37 = vpop.f32.mrf.mxu3  ;;  %v268_v41 = vadd.f32 %v256_v30, %v182_v38  ;;  %v196_v42 = vpop.f32.mrf.mxu1  ;;  %v266_v63 = vadd.f32 %v258_v49, %v208_v33  ;;  %v1529_v30 = vld [vmem:[#allocation9 + $0x168] sm:$0xf]  ;;  %v1818_v33 = vor.u32 %v1982_v27, %v1817_v26  ;;  %v1579_v26 = vld [vmem:[#allocation9 + $0x1d8] sm:$0xf0]  ;;  %v1754_v27 = vor.u32 %v1966_v19, %v1753_v18  ;;  %v1904_v18 = vld [vmem:[#allocation9 + $0x14c] sm:$0xf] }
  0xa8   :  { %v269_v43 = vadd.f32 %v257_v31, %v196_v42  ;;  %v267_v4 = vadd.f32 %v259_v53, %v222_v37  ;;  %v1910_v31 = vld [vmem:[#allocation9 + $0x174] sm:$0xf0]  ;;  %v1801_v38 = vld [vmem:[#allocation9 + $0x388] sm:$0xf]  ;;  %v1515_v19 = vld [vmem:[#allocation9 + $0x158] sm:$0xf0] }
  0xa9   :  { %v2216_v45 = vpack.c.bf16 %v268_v41, %v264_v32  ;;  %v1690_v32 = vor.u32 %v1950_v24, %v1689_v23  ;;  %v1530_v37 = vor.u32 %v1910_v31, %v1529_v30  ;;  %v1874_v41 = vld [vmem:[#allocation9 + $0x54] sm:$0xf0]  ;;  %v1513_v42 = vld [vmem:[#allocation9 + $0x148] sm:$0xf]  ;;  %v1451_v24 = vld [vmem:[#allocation9 + $0xd8] sm:$0xf0] }
  0xaa   :  { %v2218_v50 = vpack.c.bf16 %v269_v43, %v265_v36  ;;  %v1402_v36 = vor.u32 %v1878_v29, %v1401_v28  ;;  %v1906_v43 = vld [vmem:[#allocation9 + $0x154] sm:$0xf0]  ;;  %v1609_v28 = vld [vmem:[#allocation9 + $0x208] sm:$0xf] }
  0xab   :  { %1062 = vmatmul.bf16.vlgmr.msrb.gmra.mxu0 %v2216_v45  ;;  %v1514_v51 = vor.u32 %v1906_v43, %v1513_v42  ;;  %v1930_v29 = vld [vmem:[#allocation9 + $0x214] sm:$0xf0]  ;;  %v1737_v30 = vld [vmem:[#allocation9 + $0x308] sm:$0xf]  ;;  %v1563_v42 = vld [vmem:[#allocation9 + $0x1b8] sm:$0xf0] }
  0xac   :  { %1076 = vmatmul.bf16.vlgmr.msrb.gmra.mxu1 %v2218_v50  ;;  %1166 = vmatpush.bf16.msrb.mxu0 %v1466_v44  ;;  %v1674_v44 = vor.u32 %v1946_v35, %v1673_v34  ;;  %v1962_v31 = vld [vmem:[#allocation9 + $0x314] sm:$0xf0] }
  0xad   :  { %1180 = vmatpush.bf16.msrb.mxu1 %v1594_v46  ;;  %v1802_v46 = vor.u32 %v1978_v39, %v1801_v38  ;;  %v1884_v38 = vld [vmem:[#allocation9 + $0xac] sm:$0xf]  ;;  %v1610_v39 = vor.u32 %v1930_v29, %v1609_v28  ;;  %v1738_v43 = vor.u32 %v1962_v31, %v1737_v30  ;;  %v1371_v29 = vld [vmem:[#allocation9 + $0x38] sm:$0xf0] }
  0xae   :  { %v210_v58 = vpop.f32.mrf.mxu2  ;;  %v1868_v28 = vld [vmem:[#allocation9 + $0x2c] sm:$0xf]  ;;  %v1499_v31 = vld [vmem:[#allocation9 + $0x138] sm:$0xf0] }
  0xaf   :  { %v270_v0 = vadd.f32 %v258_v49, %v210_v58  ;;  %v224_v1 = vpop.f32.mrf.mxu3  ;;  %v1386_v49 = vor.u32 %v1874_v41, %v1385_v40  ;;  %v1658_v58 = vor.u32 %v1942_v48, %v1657_v47  ;;  %v1435_v40 = vld [vmem:[#allocation9 + $0xb8] sm:$0xf0]  ;;  %v1916_v41 = vld [vmem:[#allocation9 + $0x1ac] sm:$0xf] }
  0xb0   :  { %v271_v5 = vadd.f32 %v259_v53, %v224_v1  ;;  %1167 = vmatpush.bf16.msrb.mxu0 %v1450_v54  ;;  %v1974_v53 = vld [vmem:[#allocation9 + $0x374] sm:$0xf0]  ;;  %v1369_v54 = vld [vmem:[#allocation9 + $0x28] sm:$0xf]  ;;  %v1952_v47 = vld [vmem:[#allocation9 + $0x2cc] sm:$0xf] }
  0xb1   :  { %v2222_v7 = vpack.c.bf16 %v270_v0, %v266_v63  ;;  %1181 = vmatpush.bf16.msrb.mxu1 %v1578_v59  ;;  %v1786_v59 = vor.u32 %v1974_v53, %v1785_v52  ;;  %v1370_v63 = vor.u32 %v1870_v55, %v1369_v54  ;;  %v1498_v0 = vor.u32 %v1902_v57, %v1497_v56  ;;  %v1970_v1 = vld [vmem:[#allocation9 + $0x354] sm:$0xf0]  ;;  %v1707_v48 = vld [vmem:[#allocation9 + $0x2d8] sm:$0xf0]  ;;  %v1984_v52 = vld [vmem:[#allocation9 + $0x3cc] sm:$0xf] }
  0xb2   :  { %v2224_v13 = vpack.c.bf16 %v271_v5, %v267_v4  ;;  %v1481_v4 = vld [vmem:[#allocation9 + $0x108] sm:$0xf]  ;;  %v1898_v5 = vld [vmem:[#allocation9 + $0x114] sm:$0xf0]  ;;  %v1770_v12 = vor.u32 %v1970_v1, %v1769_v62  ;;  %v1835_v53 = vld [vmem:[#allocation9 + $0x3d8] sm:$0xf0] }
  0xb3   :  { %1090 = vmatmul.bf16.vlgmr.msrb.gmra.mxu2 %v2222_v7  ;;  %v1482_v17 = vor.u32 %v1898_v5, %v1481_v4  ;;  %v1880_v54 = vld [vmem:[#allocation9 + $0x8c] sm:$0xf]  ;;  %v1419_v55 = vld [vmem:[#allocation9 + $0x98] sm:$0xf0] }
  0xb4   :  { %1104 = vmatmul.bf16.vlgmr.msrb.gmra.mxu3 %v2224_v13  ;;  %1194 = vmatpush.bf16.msrb.mxu2 %v1722_v6  ;;  %v1892_v6 = vld [vmem:[#allocation9 + $0xec] sm:$0xf]  ;;  %v1547_v57 = vld [vmem:[#allocation9 + $0x198] sm:$0xf0]  ;;  %v1422_v62 = vor.u32 %v1880_v54, %v1419_v55 }
  0xb5   :  { %1208 = vmatpush.bf16.msrb.mxu3 %v1850_v8  ;;  %1168 = vmatpush.bf16.msrb.mxu0 %v1434_v9  ;;  %v1642_v8 = vor.u32 %v1938_v61, %v1641_v60  ;;  %v1467_v9 = vld [vmem:[#allocation9 + $0xf8] sm:$0xf0]  ;;  %v1912_v56 = vld [vmem:[#allocation9 + $0x18c] sm:$0xf] }
  0xb6   :  { %1182 = vmatpush.bf16.msrb.mxu1 %v1562_v14  ;;  %v1625_v14 = vld [vmem:[#allocation9 + $0x228] sm:$0xf]  ;;  %v1948_v60 = vld [vmem:[#allocation9 + $0x2ac] sm:$0xf]  ;;  %v1691_v61 = vld [vmem:[#allocation9 + $0x2b8] sm:$0xf0] }
  0xb7   :  { %v1626_v23 = vor.u32 %v1934_v15, %v1625_v14  ;;  %v1819_v1 = vld [vmem:[#allocation9 + $0x3b8] sm:$0xf0]  ;;  %v1908_v4 = vld [vmem:[#allocation9 + $0x16c] sm:$0xf] }
  0xb8   :  { %1195 = vmatpush.bf16.msrb.mxu2 %v1706_v20  ;;  %v1470_v20 = vor.u32 %v1892_v6, %v1467_v9  ;;  %v1531_v5 = vld [vmem:[#allocation9 + $0x178] sm:$0xf0]  ;;  %v1694_v6 = vor.u32 %v1948_v60, %v1691_v61  ;;  %v1944_v9 = vld [vmem:[#allocation9 + $0x28c] sm:$0xf] }
  0xb9   :  { %1209 = vmatpush.bf16.msrb.mxu3 %v1834_v21  ;;  %1169 = vmatpush.bf16.msrb.mxu0 %v1418_v22  ;;  %v1598_v21 = vor.u32 %v1924_v10, %v1595_v11  ;;  %v1888_v22 = vld [vmem:[#allocation9 + $0xcc] sm:$0xf]  ;;  %v1675_v10 = vld [vmem:[#allocation9 + $0x298] sm:$0xf0]  ;;  %v1406_v11 = vor.u32 %v1876_v2, %v1403_v3 }
  0xba   :  { %1183 = vmatpush.bf16.msrb.mxu1 %v1546_v25  ;;  %v1920_v25 = vld [vmem:[#allocation9 + $0x1cc] sm:$0xf]  ;;  %v1454_v34 = vor.u32 %v1888_v22, %v1451_v24  ;;  %v1803_v15 = vld [vmem:[#allocation9 + $0x398] sm:$0xf0] }
  0xbb   :  { %1118 = vmatmul.bf16.vlgmr.msra.gmra.mxu0 %v2216_v45  ;;  %v1582_v35 = vor.u32 %v1920_v25, %v1579_v26  ;;  %v1976_v14 = vld [vmem:[#allocation9 + $0x38c] sm:$0xf]  ;;  %v1518_v25 = vor.u32 %v1904_v18, %v1515_v19 }
  0xbc   :  { %1196 = vmatpush.bf16.msrb.mxu2 %v1690_v32  ;;  %1132 = vmatmul.bf16.vlgmr.msra.gmra.mxu1 %v2218_v50  ;;  %v1956_v32 = vld [vmem:[#allocation9 + $0x2ec] sm:$0xf] }
  0xbd   :  { %1210 = vmatpush.bf16.msrb.mxu3 %v1818_v33  ;;  %1170 = vmatpush.bf16.msrb.mxu0 %v1402_v36  ;;  %v1723_v33 = vld [vmem:[#allocation9 + $0x2f8] sm:$0xf0]  ;;  %v1988_v36 = vld [vmem:[#allocation9 + $0x3ec] sm:$0xf] }
  0xbe   :  { %1184 = vmatpush.bf16.msrb.mxu1 %v1530_v37  ;;  %v1851_v37 = vld [vmem:[#allocation9 + $0x3f8] sm:$0xf0]  ;;  %v1940_v22 = vld [vmem:[#allocation9 + $0x26c] sm:$0xf] }
  0xbf   :  { %v1972_v26 = vld [vmem:[#allocation9 + $0x36c] sm:$0xf] }
  0xc0   :  { %1197 = vmatpush.bf16.msrb.mxu2 %v1674_v44  ;;  %v1726_v44 = vor.u32 %v1956_v32, %v1723_v33  ;;  %v1900_v30 = vld [vmem:[#allocation9 + $0x12c] sm:$0xf] }
  0xc1   :  { %1211 = vmatpush.bf16.msrb.mxu3 %v1802_v46  ;;  %1171 = vmatpush.bf16.msrb.mxu0 %v1386_v49  ;;  %v1854_v46 = vor.u32 %v1988_v36, %v1851_v37  ;;  %v1438_v49 = vor.u32 %v1884_v38, %v1435_v40  ;;  %v1374_v36 = vor.u32 %v1868_v28, %v1371_v29  ;;  %v1968_v38 = vld [vmem:[#allocation9 + $0x34c] sm:$0xf] }
  0xc2   :  { %1185 = vmatpush.bf16.msrb.mxu1 %v1514_v51  ;;  %v1566_v51 = vor.u32 %v1916_v41, %v1563_v42  ;;  %v1502_v37 = vor.u32 %v1900_v30, %v1499_v31  ;;  %v1864_v40 = vld [vmem:[#allocation9 + $0xc] sm:$0xf]  ;;  %v1355_v41 = vld [vmem:[#allocation9 + $0x18] sm:$0xf0] }
  0xc3   :  { %1146 = vmatmul.bf16.vlgmr.msra.gmra.mxu2 %v2222_v7  ;;  %v1896_v42 = vld [vmem:[#allocation9 + $0x10c] sm:$0xf] }
  0xc4   :  { %1160 = vmatmul.bf16.vlgmr.msra.gmra.mxu3 %v2224_v13  ;;  %1198 = vmatpush.bf16.msrb.mxu2 %v1658_v58  ;;  %v1710_v58 = vor.u32 %v1952_v47, %v1707_v48  ;;  %v1932_v47 = vld [vmem:[#allocation9 + $0x22c] sm:$0xf]  ;;  %v1627_v48 = vld [vmem:[#allocation9 + $0x238] sm:$0xf0] }
  0xc5   :  { %1212 = vmatpush.bf16.msrb.mxu3 %v1786_v59  ;;  %1172 = vmatpush.bf16.msrb.mxu0 %v1370_v63  ;;  %v1838_v59 = vor.u32 %v1984_v52, %v1835_v53  ;;  %v1550_v63 = vor.u32 %v1912_v56, %v1547_v57  ;;  %v1964_v52 = vld [vmem:[#allocation9 + $0x32c] sm:$0xf]  ;;  %v1755_v53 = vld [vmem:[#allocation9 + $0x338] sm:$0xf0]  ;;  %v1630_v54 = vor.u32 %v1932_v47, %v1627_v48 }
  0xc6   :  { %1186 = vmatpush.bf16.msrb.mxu1 %v1498_v0  ;;  %v1980_v0 = vld [vmem:[#allocation9 + $0x3ac] sm:$0xf]  ;;  %v1758_v55 = vor.u32 %v1964_v52, %v1755_v53  ;;  %v1611_v57 = vld [vmem:[#allocation9 + $0x218] sm:$0xf0] }
  0xc7   :  { %v1928_v56 = vld [vmem:[#allocation9 + $0x20c] sm:$0xf] }
  0xc8   :  { %1199 = vmatpush.bf16.msrb.mxu2 %v1642_v8  ;;  %v1822_v8 = vor.u32 %v1980_v0, %v1819_v1  ;;  %v1614_v60 = vor.u32 %v1928_v56, %v1611_v57 }
  0xc9   :  { %1213 = vmatpush.bf16.msrb.mxu3 %v1770_v12  ;;  %1173 = vmatpush.bf16.msrb.mxu0 %v1354_v16  ;;  %v1534_v12 = vor.u32 %v1908_v4, %v1531_v5  ;;  %v1872_v16 = vld [vmem:[#allocation9 + $0x4c] sm:$0xf] }
  0xca   :  { %1187 = vmatpush.bf16.msrb.mxu1 %v1482_v17  ;;  %v1387_v17 = vld [vmem:[#allocation9 + $0x58] sm:$0xf0] }
  0xcb   :  { %v1390_v24 = vor.u32 %v1872_v16, %v1387_v17 }
  0xcc   :  { %1200 = vmatpush.bf16.msrb.mxu2 %v1626_v23  ;;  %1174 = vmatmul.bf16.vlgmr.msrb.gmra.mxu0 %v2216_v45  ;;  %v1659_v23 = vld [vmem:[#allocation9 + $0x278] sm:$0xf0] }
  0xcd   :  { %1222 = vmatpush.bf16.msra.mxu0 %v1470_v20  ;;  %1214 = vmatpush.bf16.msrb.mxu3 %v1754_v27  ;;  %v1678_v20 = vor.u32 %v1944_v9, %v1675_v10  ;;  %v1787_v27 = vld [vmem:[#allocation9 + $0x378] sm:$0xf0]  ;;  %v1662_v32 = vor.u32 %v1940_v22, %v1659_v23 }
  0xce   :  { %1236 = vmatpush.bf16.msra.mxu1 %v1598_v21  ;;  %v1806_v21 = vor.u32 %v1976_v14, %v1803_v15  ;;  %v1790_v33 = vor.u32 %v1972_v26, %v1787_v27 }
  0xcf   :  { %1188 = vmatmul.bf16.vlgmr.msrb.gmra.mxu1 %v2218_v50 }
  0xd0   :  { %1201 = vmatpush.bf16.msrb.mxu2 %v1610_v39  ;;  %v1771_v39 = vld [vmem:[#allocation9 + $0x358] sm:$0xf0] }
  0xd1   :  { %1223 = vmatpush.bf16.msra.mxu0 %v1454_v34  ;;  %1215 = vmatpush.bf16.msrb.mxu3 %v1738_v43  ;;  %v1936_v34 = vld [vmem:[#allocation9 + $0x24c] sm:$0xf]  ;;  %v1483_v43 = vld [vmem:[#allocation9 + $0x118] sm:$0xf0] }
  0xd2   :  { %1237 = vmatpush.bf16.msra.mxu1 %v1582_v35  ;;  %v1643_v35 = vld [vmem:[#allocation9 + $0x258] sm:$0xf0] }
  0xd3   :  { %1202 = vmatmul.bf16.vlgmr.msrb.gmra.mxu2 %v2222_v7 }
  0xd4   :  { %1250 = vmatpush.bf16.msra.mxu2 %v1726_v44  ;;  %1216 = vmatmul.bf16.vlgmr.msrb.gmra.mxu3 %v2224_v13  ;;  %v1646_v44 = vor.u32 %v1936_v34, %v1643_v35 }
  0xd5   :  { %1264 = vmatpush.bf16.msra.mxu3 %v1854_v46  ;;  %1224 = vmatpush.bf16.msra.mxu0 %v1438_v49  ;;  %v1774_v46 = vor.u32 %v1968_v38, %v1771_v39  ;;  %v1358_v49 = vor.u32 %v1864_v40, %v1355_v41 }
  0xd6   :  { %1238 = vmatpush.bf16.msra.mxu1 %v1566_v51  ;;  %v1486_v51 = vor.u32 %v1896_v42, %v1483_v43 }
  0xd8   :  { %1251 = vmatpush.bf16.msra.mxu2 %v1710_v58  ;;  %v1960_v58 = vld [vmem:[#allocation9 + $0x30c] sm:$0xf] }
  0xd9   :  { %1265 = vmatpush.bf16.msra.mxu3 %v1838_v59  ;;  %1225 = vmatpush.bf16.msra.mxu0 %v1422_v62  ;;  %v1739_v59 = vld [vmem:[#allocation9 + $0x318] sm:$0xf0] }
  0xda   :  { %1239 = vmatpush.bf16.msra.mxu1 %v1550_v63  ;;  %v1742_v61 = vor.u32 %v1960_v58, %v1739_v59  ;;  %v2240_v63 = vld [vmem:[#allocation11] sm:$0xf] }
  0xdb   :  { %v406_v1 = vperm.slane %v2240_v63, 0  ;;  %v408_v28 = vperm.slane %v2240_v63, 2 }
  0xdc   :  { %1252 = vmatpush.bf16.msra.mxu2 %v1694_v6 }
  0xdd   :  { %1266 = vmatpush.bf16.msra.mxu3 %v1822_v8  ;;  %1226 = vmatpush.bf16.msra.mxu0 %v1406_v11 }
  0xde   :  { %1240 = vmatpush.bf16.msra.mxu1 %v1534_v12 }
  0xe0   :  { %1253 = vmatpush.bf16.msra.mxu2 %v1678_v20 }
  0xe1   :  { %1267 = vmatpush.bf16.msra.mxu3 %v1806_v21  ;;  %1227 = vmatpush.bf16.msra.mxu0 %v1390_v24 }
  0xe2   :  { %1241 = vmatpush.bf16.msra.mxu1 %v1518_v25 }
  0xe4   :  { %1254 = vmatpush.bf16.msra.mxu2 %v1662_v32 }
  0xe5   :  { %1268 = vmatpush.bf16.msra.mxu3 %v1790_v33  ;;  %1228 = vmatpush.bf16.msra.mxu0 %v1374_v36 }
  0xe6   :  { %1242 = vmatpush.bf16.msra.mxu1 %v1502_v37 }
  0xe8   :  { %1255 = vmatpush.bf16.msra.mxu2 %v1646_v44 }
  0xe9   :  { %1269 = vmatpush.bf16.msra.mxu3 %v1774_v46  ;;  %1229 = vmatpush.bf16.msra.mxu0 %v1358_v49 }
  0xea   :  { %1243 = vmatpush.bf16.msra.mxu1 %v1486_v51  ;;  %v409_v51 = vperm.slane %v2240_v63, 3 }
  0xec   :  { %1256 = vmatpush.bf16.msra.mxu2 %v1630_v54  ;;  %1230 = vmatmul.bf16.vlgmr.msra.gmra.mxu0 %v2216_v45 }
  0xed   :  { %1270 = vmatpush.bf16.msra.mxu3 %v1758_v55  ;;  %1244 = vmatmul.bf16.vlgmr.msra.gmra.mxu1 %v2218_v50 }
  0xf0   :  { %1257 = vmatpush.bf16.msra.mxu2 %v1614_v60 }
  0xf1   :  { %1271 = vmatpush.bf16.msra.mxu3 %v1742_v61 }
  0xf3   :  { %1258 = vmatmul.bf16.vlgmr.msra.gmra.mxu2 %v2222_v7 }
  0xf4   :  { %1272 = vmatmul.bf16.vlgmr.msra.gmra.mxu3 %v2224_v13  ;;  %v407_v13 = vperm.slane %v2240_v63, 1 }
 0x128   :  { %v1063_v62 = vpop.f32.mrf.mxu0 }
 0x129   :  { %v1077_v0 = vpop.f32.mrf.mxu1  ;;  %v1064_v2 = vadd.f32 %v1063_v62, %v406_v1 }
 0x12b   :  { %v1078_v4 = vadd.f32 %v1077_v0, %v1064_v2 }
 0x130   :  { %v1065_v3 = vpop.f32.mrf.mxu0 }
 0x131   :  { %v1079_v5 = vpop.f32.mrf.mxu1  ;;  %v1066_v50 = vadd.f32 %v1065_v3, %v406_v1 }
 0x133   :  { %v1080_v7 = vadd.f32 %v1079_v5, %v1066_v50 }
 0x136   :  { %v1091_v45 = vpop.f32.mrf.mxu2 }
 0x137   :  { %v1092_v6 = vadd.f32 %v1091_v45, %v1078_v4  ;;  %v1105_v8 = vpop.f32.mrf.mxu3 }
 0x138   :  { %v1119_v10 = vpop.f32.mrf.mxu0 }
 0x139   :  { %v1106_v9 = vadd.f32 %v1105_v8, %v1092_v6  ;;  %v1133_v12 = vpop.f32.mrf.mxu1  ;;  %v1120_v16 = vadd.f32 %v1119_v10, %v407_v13 }
 0x13b   :  { %1278 = vst [vmem:[#allocation12] sm:$0xff] %v1106_v9  ;;  %v1134_v19 = vadd.f32 %v1133_v12, %v1120_v16 }
 0x13e   :  { %v1093_v11 = vpop.f32.mrf.mxu2 }
 0x13f   :  { %v1094_v14 = vadd.f32 %v1093_v11, %v1080_v7  ;;  %v1107_v15 = vpop.f32.mrf.mxu3 }
 0x140   :  { %v1121_v18 = vpop.f32.mrf.mxu0 }
 0x141   :  { %v1108_v17 = vadd.f32 %v1107_v15, %v1094_v14  ;;  %v1122_v23 = vadd.f32 %v1121_v18, %v407_v13  ;;  %v1135_v24 = vpop.f32.mrf.mxu1 }
 0x143   :  { %1282 = vst [vmem:[#allocation12 + $0x20] sm:$0xff] %v1108_v17  ;;  %v1136_v27 = vadd.f32 %v1135_v24, %v1122_v23 }
 0x146   :  { %v1147_v20 = vpop.f32.mrf.mxu2 }
 0x147   :  { %v1148_v21 = vadd.f32 %v1147_v20, %v1134_v19  ;;  %v1161_v22 = vpop.f32.mrf.mxu3 }
 0x149   :  { %v1162_v25 = vadd.f32 %v1161_v22, %v1148_v21  ;;  %v1175_v26 = vpop.f32.mrf.mxu0 }
 0x14a   :  { %v1176_v33 = vadd.f32 %v1175_v26, %v408_v28 }
 0x14b   :  { %1279 = vst [vmem:[#allocation12 + $0x8] sm:$0xff] %v1162_v25 }
 0x14c   :  { %v1189_v34 = vpop.f32.mrf.mxu1 }
 0x14d   :  { %v1190_v35 = vadd.f32 %v1189_v34, %v1176_v33 }
 0x14e   :  { %v1149_v29 = vpop.f32.mrf.mxu2 }
 0x14f   :  { %v1150_v30 = vadd.f32 %v1149_v29, %v1136_v27  ;;  %v1163_v31 = vpop.f32.mrf.mxu3 }
 0x151   :  { %v1164_v32 = vadd.f32 %v1163_v31, %v1150_v30  ;;  %v1177_v36 = vpop.f32.mrf.mxu0 }
 0x152   :  { %v1178_v40 = vadd.f32 %v1177_v36, %v408_v28 }
 0x153   :  { %1283 = vst [vmem:[#allocation12 + $0x28] sm:$0xff] %v1164_v32 }
 0x154   :  { %v1191_v42 = vpop.f32.mrf.mxu1 }
 0x155   :  { %v1192_v43 = vadd.f32 %v1191_v42, %v1178_v40 }
 0x156   :  { %v1203_v37 = vpop.f32.mrf.mxu2 }
 0x157   :  { %v1217_v38 = vpop.f32.mrf.mxu3  ;;  %v1204_v39 = vadd.f32 %v1203_v37, %v1190_v35 }
 0x159   :  { %v1218_v41 = vadd.f32 %v1217_v38, %v1204_v39 }
 0x15b   :  { %1280 = vst [vmem:[#allocation12 + $0x10] sm:$0xff] %v1218_v41 }
 0x15e   :  { %v1205_v44 = vpop.f32.mrf.mxu2 }
 0x15f   :  { %v1206_v46 = vadd.f32 %v1205_v44, %v1192_v43  ;;  %v1219_v47 = vpop.f32.mrf.mxu3 }
 0x161   :  { %v1220_v48 = vadd.f32 %v1219_v47, %v1206_v46 }
 0x163   :  { %1284 = vst [vmem:[#allocation12 + $0x30] sm:$0xff] %v1220_v48 }
 0x169   :  { %v1231_v49 = vpop.f32.mrf.mxu0 }
 0x16a   :  { %v1232_v52 = vadd.f32 %v1231_v49, %v409_v51  ;;  %v1245_v53 = vpop.f32.mrf.mxu1 }
 0x16c   :  { %v1246_v54 = vadd.f32 %v1245_v53, %v1232_v52 }
 0x171   :  { %v1233_v55 = vpop.f32.mrf.mxu0 }
 0x172   :  { %v1234_v59 = vadd.f32 %v1233_v55, %v409_v51  ;;  %v1247_v61 = vpop.f32.mrf.mxu1 }
 0x174   :  { %v1248_v62 = vadd.f32 %v1247_v61, %v1234_v59 }
 0x176   :  { %v1259_v56 = vpop.f32.mrf.mxu2 }
 0x177   :  { %v1260_v57 = vadd.f32 %v1259_v56, %v1246_v54  ;;  %v1273_v58 = vpop.f32.mrf.mxu3 }
 0x179   :  { %v1274_v60 = vadd.f32 %v1273_v58, %v1260_v57 }
 0x17b   :  { %1281 = vst [vmem:[#allocation12 + $0x18] sm:$0xff] %v1274_v60 }
 0x17e   :  { %v1261_v0 = vpop.f32.mrf.mxu2 }
 0x17f   :  { %v1262_v63 = vadd.f32 %v1261_v0, %v1248_v62  ;;  %v1275_v1 = vpop.f32.mrf.mxu3 }
 0x181   :  { %v1276_v2 = vadd.f32 %v1275_v1, %v1262_v63 }
 0x183   :  { %1285 = vst [vmem:[#allocation12 + $0x38] sm:$0xff] %v1276_v2 }
 0x184   :  { %1298 = dma.vmem_to_hbm [thread:$0]  %s1291_s4, 1024, %s1293_s21, [#allocation5], %s2165_s22, %s2165_s22, %s2166_s23  }
 0x185   :  { %2153 = dma.done.wait [#allocation5], 1024  }
 0x186   :  { %2154 = vsyncadd [#allocation5], 4294966272 }
 0x187   :  { %1303 = vsyncpa [#allocation4], 1 }
 0x188   :  { %1304 = vsyncpa [#allocation7], 1 }
 0x189   :  { %1305 = vsyncpa [#allocation10], 1 }
 0x18a   :  { %1306 = vsyncpa [#allocation5], 1 }

</bundles_post_ra>
